<compile_context>
chip_gen: v7x
topology: tpu7x:2x2x1
jax: 0.10.0
libtpu: 0.0.40
codegen_flags: <defaults>
</compile_context>

<pallas_src>
import functools
import math

import jax
import jax.numpy as jnp
from jax import lax
from jax.experimental import pallas as pl
from jax.experimental.pallas import tpu as pltpu


def _gelu_exact(x):
    # PyTorch nn.GELU() default = exact erf formulation (computed in f32).
    return 0.5 * x * (1.0 + lax.erf(x * (1.0 / math.sqrt(2.0))))


def _round_up(n, m):
    return ((n + m - 1) // m) * m


def _default_vmem_limit_bytes():
    # Leave headroom below physical VMEM (64 MiB on v7x, 128 MiB on v5e/v6e).
    try:
        cap = pltpu.get_tpu_info().vmem_capacity_bytes
        return int(cap * 0.85)
    except Exception:
        return 56 * 1024 * 1024


def ff_kernel(x_ref, w1_ref, b1_ref, w2_ref, b2_ref, o_ref, acc_ref):
    k = pl.program_id(1)

    @pl.when(k == 0)
    def _init():
        # Fold b2 into the accumulator init so it is added exactly once.
        acc_ref[...] = jnp.broadcast_to(
            b2_ref[...].astype(jnp.float32), acc_ref.shape)

    # First matmul over this hidden chunk: (tm, dim) @ (dim, th) -> (tm, th), f32 acc.
    h = jnp.dot(x_ref[...], w1_ref[...], preferred_element_type=jnp.float32)
    h = h + b1_ref[...].astype(jnp.float32)          # chunk-local bias, correct per chunk
    h = _gelu_exact(h)
    # TODO(synk): dropout is identity at inference (p=0.0 default) -> omitted.

    # Second matmul accumulates hidden chunks: (tm, th) @ (th, dim) -> (tm, dim).
    acc_ref[...] += jnp.dot(h.astype(w2_ref.dtype), w2_ref[...],
                            preferred_element_type=jnp.float32)

    @pl.when(k == pl.num_programs(1) - 1)
    def _finalize():
        o_ref[...] = acc_ref[...].astype(o_ref.dtype)


def feed_forward(x, w1, b1, w2, b2, *, token_tile=256, hidden_tile=512):
    """x: (batch, seq, dim). w1: (dim, hidden), b1: (hidden,), w2: (hidden, dim), b2: (dim,)."""
    batch, seq, dim = x.shape
    hidden = w1.shape[1]
    n_tok = batch * seq

    # Adaptive token tile: target 256 rows for MXU occupancy, but never exceed the
    # (8-rounded) token count; pad ragged token counts instead of asserting.
    tm = min(token_tile, _round_up(n_tok, 8))
    n_pad = _round_up(n_tok, tm)

    # Hidden tile: a lane-aligned chunk if it divides evenly, else the full hidden dim
    # (small models). Keeps per-step weight blocks bounded for v7x's 64 MiB VMEM.
    if hidden % hidden_tile == 0 and hidden_tile % 128 == 0:
        th = hidden_tile
    else:
        th = hidden

    x2d = x.reshape(n_tok, dim)
    if n_pad != n_tok:
        x2d = jnp.pad(x2d, ((0, n_pad - n_tok), (0, 0)))
    b1_2d = b1.reshape(1, hidden)
    b2_2d = b2.reshape(1, dim)

    grid = (n_pad // tm, hidden // th)

    out2d = pl.pallas_call(
        ff_kernel,
        out_shape=jax.ShapeDtypeStruct((n_pad, dim), x.dtype),
        grid_spec=pltpu.PrefetchScalarGridSpec(
            num_scalar_prefetch=0,
            grid=grid,
            in_specs=[
                pl.BlockSpec((tm, dim), lambda i, k: (i, 0)),    # x tile
                pl.BlockSpec((dim, th), lambda i, k: (0, k)),    # W1 hidden chunk
                pl.BlockSpec((1, th), lambda i, k: (0, k)),      # b1 hidden chunk
                pl.BlockSpec((th, dim), lambda i, k: (k, 0)),    # W2 hidden chunk
                pl.BlockSpec((1, dim), lambda i, k: (0, 0)),     # b2 (full)
            ],
            out_specs=pl.BlockSpec((tm, dim), lambda i, k: (i, 0)),
            scratch_shapes=[pltpu.VMEM((tm, dim), jnp.float32)],
        ),
        compiler_params=pltpu.CompilerParams(
            dimension_semantics=("parallel", "arbitrary"),
            vmem_limit_bytes=_default_vmem_limit_bytes(),
        ),
    )(x2d, w1, b1_2d, w2, b2_2d)

    return out2d[:n_tok].reshape(batch, seq, dim)


def _reference(x, w1, b1, w2, b2):
    h = jnp.einsum("bsd,dh->bsh", x.astype(jnp.float32), w1.astype(jnp.float32))
    h = h + b1.astype(jnp.float32)
    h = 0.5 * h * (1.0 + lax.erf(h / jnp.sqrt(2.0)))
    y = jnp.einsum("bsh,hd->bsd", h, w2.astype(jnp.float32)) + b2.astype(jnp.float32)
    return y.astype(x.dtype)


if __name__ == "__main__":
    # Small shapes consistent with the module: dim=32, hidden=64.
    batch, seq, dim, hidden = 2, 8, 32, 64

    key = jax.random.PRNGKey(0)
    kx, k1, k2, k3, k4 = jax.random.split(key, 5)

    x = jax.random.normal(kx, (batch, seq, dim), dtype=jnp.float32)

    # PyTorch-Linear-style init (uniform(-1/sqrt(fan_in), 1/sqrt(fan_in))),
    # stored pre-transposed as (in, out).
    lim1 = 1.0 / math.sqrt(dim)
    lim2 = 1.0 / math.sqrt(hidden)
    w1 = jax.random.uniform(k1, (dim, hidden), jnp.float32, -lim1, lim1)
    b1 = jax.random.uniform(k2, (hidden,), jnp.float32, -lim1, lim1)
    w2 = jax.random.uniform(k3, (hidden, dim), jnp.float32, -lim2, lim2)
    b2 = jax.random.uniform(k4, (dim,), jnp.float32, -lim2, lim2)

    out = feed_forward(x, w1, b1, w2, b2)
    out = jax.block_until_ready(out)
    ref = _reference(x, w1, b1, w2, b2)
    assert out.shape == (batch, seq, dim)
    assert jnp.allclose(out, ref, atol=1e-5, rtol=1e-5), "mismatch vs reference"

    # Ragged token count (batch*seq not a multiple of 8) -> exercises the padding path.
    x_rag = jax.random.normal(kx, (batch, 7, dim), dtype=jnp.float32)
    out_rag = jax.block_until_ready(feed_forward(x_rag, w1, b1, w2, b2))
    ref_rag = _reference(x_rag, w1, b1, w2, b2)
    assert out_rag.shape == (batch, 7, dim)
    assert jnp.allclose(out_rag, ref_rag, atol=1e-5, rtol=1e-5), "ragged mismatch vs reference"

    print("KERNEL_OK")
</pallas_src>

<mosaic_0001>
module attributes {stable_mosaic.version = 11 : i64} {
  func.func @ff_kernel(%arg0: i32, %arg1: i32, %arg2: memref<16x32xf32, #tpu.memory_space<vmem>>, %arg3: memref<32x64xf32, #tpu.memory_space<vmem>>, %arg4: memref<1x64xf32, #tpu.memory_space<vmem>>, %arg5: memref<64x32xf32, #tpu.memory_space<vmem>>, %arg6: memref<1x32xf32, #tpu.memory_space<vmem>>, %arg7: memref<16x32xf32, #tpu.memory_space<vmem>>, %arg8: memref<16x32xf32, #tpu.memory_space<vmem>>) attributes {dimension_semantics = [#tpu.dimension_semantics<parallel>, #tpu.dimension_semantics<arbitrary>], iteration_bounds = array<i64: 1, 1>, scalar_prefetch = 0 : i64, scratch_operands = 1 : i64, tpu.core_type = #tpu.core_type<tc>, window_params = [{transform_indices = @transform_0, window_bounds = array<i64: 16, 32>}, {transform_indices = @transform_1, window_bounds = array<i64: 32, 64>}, {transform_indices = @transform_2, window_bounds = array<i64: 1, 64>}, {transform_indices = @transform_3, window_bounds = array<i64: 64, 32>}, {pipeline_mode = #tpu.pipeline_mode<synchronous>, transform_indices = @transform_4, window_bounds = array<i64: 1, 32>}, {transform_indices = @transform_5, window_bounds = array<i64: 16, 32>}]} {
    %c0_i32 = arith.constant 0 : i32
    %0 = arith.cmpi eq, %arg1, %c0_i32 : i32
    %1 = arith.extui %0 : i1 to i32
    %c0_i32_0 = arith.constant 0 : i32
    %2 = arith.cmpi ne, %1, %c0_i32_0 : i32
    scf.if %2 {
      %c0_18 = arith.constant 0 : index
      %c0_19 = arith.constant 0 : index
      %25 = vector.load %arg6[%c0_18, %c0_19] : memref<1x32xf32, #tpu.memory_space<vmem>>, vector<1x32xf32>
      %26 = vector.shape_cast %25 : vector<1x32xf32> to vector<1x32xf32>
      %27 = vector.broadcast %26 : vector<1x32xf32> to vector<16x32xf32>
      %c0_20 = arith.constant 0 : index
      %c0_21 = arith.constant 0 : index
      %28 = vector.load %arg8[%c0_20, %c0_21] : memref<16x32xf32, #tpu.memory_space<vmem>>, vector<16x32xf32>
      tpu.vector_store %arg8[%c0_20, %c0_21], %27 {strides = array<i32>} : memref<16x32xf32, #tpu.memory_space<vmem>>, vector<16x32xf32>,
    } else {
    }
    %c0 = arith.constant 0 : index
    %c0_1 = arith.constant 0 : index
    %3 = vector.load %arg2[%c0, %c0_1] : memref<16x32xf32, #tpu.memory_space<vmem>>, vector<16x32xf32>
    %c0_2 = arith.constant 0 : index
    %c0_3 = arith.constant 0 : index
    %4 = vector.load %arg3[%c0_2, %c0_3] : memref<32x64xf32, #tpu.memory_space<vmem>>, vector<32x64xf32>
    %cst = arith.constant dense<0.000000e+00> : vector<16x64xf32>
    %5 = tpu.matmul %3, %4, %cst {dimension_numbers = #tpu.dot_dimension_numbers<[1], [0], [0], [1], [0, 0, 1, 1], [], []>} : vector<16x32xf32>, vector<32x64xf32>, vector<16x64xf32> -> vector<16x64xf32>
    %c0_4 = arith.constant 0 : index
    %c0_5 = arith.constant 0 : index
    %6 = vector.load %arg4[%c0_4, %c0_5] : memref<1x64xf32, #tpu.memory_space<vmem>>, vector<1x64xf32>
    %7 = vector.broadcast %6 : vector<1x64xf32> to vector<16x64xf32>
    %8 = arith.addf %5, %7 : vector<16x64xf32>
    %cst_6 = arith.constant 5.000000e-01 : f32
    %9 = vector.broadcast %cst_6 : f32 to vector<16x64xf32>
    %10 = arith.mulf %9, %8 : vector<16x64xf32>
    %cst_7 = arith.constant 0.707106769 : f32
    %11 = vector.broadcast %cst_7 : f32 to vector<16x64xf32>
    %12 = arith.mulf %8, %11 : vector<16x64xf32>
    %13 = math.erf %12 : vector<16x64xf32>
    %cst_8 = arith.constant 1.000000e+00 : f32
    %14 = vector.broadcast %cst_8 : f32 to vector<16x64xf32>
    %15 = arith.addf %14, %13 : vector<16x64xf32>
    %16 = arith.mulf %10, %15 : vector<16x64xf32>
    %c0_9 = arith.constant 0 : index
    %c0_10 = arith.constant 0 : index
    %17 = vector.load %arg8[%c0_9, %c0_10] : memref<16x32xf32, #tpu.memory_space<vmem>>, vector<16x32xf32>
    %c0_11 = arith.constant 0 : index
    %c0_12 = arith.constant 0 : index
    %18 = vector.load %arg5[%c0_11, %c0_12] : memref<64x32xf32, #tpu.memory_space<vmem>>, vector<64x32xf32>
    %cst_13 = arith.constant dense<0.000000e+00> : vector<16x32xf32>
    %19 = tpu.matmul %16, %18, %cst_13 {dimension_numbers = #tpu.dot_dimension_numbers<[1], [0], [0], [1], [0, 0, 1, 1], [], []>} : vector<16x64xf32>, vector<64x32xf32>, vector<16x32xf32> -> vector<16x32xf32>
    %20 = arith.addf %17, %19 : vector<16x32xf32>
    %c0_14 = arith.constant 0 : index
    %c0_15 = arith.constant 0 : index
    %21 = vector.load %arg8[%c0_14, %c0_15] : memref<16x32xf32, #tpu.memory_space<vmem>>, vector<16x32xf32>
    tpu.vector_store %arg8[%c0_14, %c0_15], %20 {strides = array<i32>} : memref<16x32xf32, #tpu.memory_space<vmem>>, vector<16x32xf32>,
    %c0_i32_16 = arith.constant 0 : i32
    %22 = arith.cmpi eq, %arg1, %c0_i32_16 : i32
    %23 = arith.extui %22 : i1 to i32
    %c0_i32_17 = arith.constant 0 : i32
    %24 = arith.cmpi ne, %23, %c0_i32_17 : i32
    scf.if %24 {
      %c0_18 = arith.constant 0 : index
      %c0_19 = arith.constant 0 : index
      %25 = vector.load %arg8[%c0_18, %c0_19] : memref<16x32xf32, #tpu.memory_space<vmem>>, vector<16x32xf32>
      %c0_20 = arith.constant 0 : index
      %c0_21 = arith.constant 0 : index
      %26 = vector.load %arg7[%c0_20, %c0_21] : memref<16x32xf32, #tpu.memory_space<vmem>>, vector<16x32xf32>
      tpu.vector_store %arg7[%c0_20, %c0_21], %25 {strides = array<i32>} : memref<16x32xf32, #tpu.memory_space<vmem>>, vector<16x32xf32>,
    } else {
    }
    return
  }
  func.func @transform_0(%arg0: i32, %arg1: i32) -> (i32, i32) {
    %c0_i32 = arith.constant 0 : i32
    %c0_i32_0 = arith.constant 0 : i32
    return %arg0, %c0_i32 : i32, i32
  }
  func.func @transform_1(%arg0: i32, %arg1: i32) -> (i32, i32) {
    %c0_i32 = arith.constant 0 : i32
    %c0_i32_0 = arith.constant 0 : i32
    return %c0_i32, %arg1 : i32, i32
  }
  func.func @transform_2(%arg0: i32, %arg1: i32) -> (i32, i32) {
    %c0_i32 = arith.constant 0 : i32
    %c0_i32_0 = arith.constant 0 : i32
    return %c0_i32, %arg1 : i32, i32
  }
  func.func @transform_3(%arg0: i32, %arg1: i32) -> (i32, i32) {
    %c0_i32 = arith.constant 0 : i32
    %c0_i32_0 = arith.constant 0 : i32
    return %arg1, %c0_i32 : i32, i32
  }
  func.func @transform_4(%arg0: i32, %arg1: i32) -> (i32, i32) {
    %c0_i32 = arith.constant 0 : i32
    %c0_i32_0 = arith.constant 0 : i32
    %c0_i32_1 = arith.constant 0 : i32
    return %c0_i32, %c0_i32_0 : i32, i32
  }
  func.func @transform_5(%arg0: i32, %arg1: i32) -> (i32, i32) {
    %c0_i32 = arith.constant 0 : i32
    %c0_i32_0 = arith.constant 0 : i32
    return %arg0, %c0_i32 : i32, i32
  }
}

</mosaic_0001>

<bundles_post_ra>
// kernel: tpu_custom_call.1
= control target key start
LH: loop header
LB: loop body
LE: loop exit
PB: predicated region body
PF: predicated region fallthrough
CT: control target
= control target key end

     0   :  { %vm32_vm0 = vcmask 261120   ;;  %s467_s0 = inlined_call_operand.vmem [shape: f32[16,32], index: 0, kind: input, shape index: {}]   ;;  %s468_s1 = inlined_call_operand.vmem [shape: f32[32,64], index: 1, kind: input, shape index: {}]   ;;  %s469_s2 = inlined_call_operand.vmem [shape: f32[1,64], index: 2, kind: input, shape index: {}]   ;;  %s470_s3 = inlined_call_operand.vmem [shape: f32[64,32], index: 3, kind: input, shape index: {}]   ;;  %s471_s4 = inlined_call_operand.vmem [shape: f32[1,32], index: 4, kind: input, shape index: {}]   ;;  %s472_s5 = inlined_call_operand.hbm [shape: f32[16,32], index: 5, kind: output, shape index: {}]  }
   0x1   :  { %v37_v0 = vld [vmem:[%s468_s1] sm:$0xff]  ;;  %v38_v1 = vld [vmem:[%s468_s1 + $0x8] sm:$0xff]  ;;  %v39_v2 = vld [vmem:[%s468_s1 + $0x10] sm:$0xff] }
   0x2   :  { %v311_v3 = vpack.c.bf16 %v38_v1, %v37_v0  ;;  %v40_v4 = vld [vmem:[%s468_s1 + $0x18] sm:$0xff]  ;;  %v35_v5 = vld [vmem:[%s467_s0] sm:$0xff] }
   0x3   :  { %v315_v6 = vpack.c.bf16 %v40_v4, %v39_v2  ;;  %289 = vmatprep.mubr.msk.f32.mxu0 %vm32_vm0, %v35_v5 }
   0x4   :  { %10 = vsyncpa [#allocation4], 0  ;;  %312 = vmatprep.subr.bf16.mxu0 %v311_v3  ;;  %v36_v7 = vld [vmem:[%s467_s0 + $0x8] sm:$0xff]  ;;  %v142_v8 = vld [vmem:[%s470_s3] sm:$0xff]  ;;  %vm150_vm1 = vcmask 523264  }
   0x5   :  { %314 = vmatpush3.bf16.msra.mxu0 %v311_v3  ;;  %v143_v9 = vld [vmem:[%s470_s3 + $0x8] sm:$0xff]  ;;  %v144_v11 = vld [vmem:[%s470_s3 + $0x10] sm:$0xff]  ;;  %v145_v12 = vld [vmem:[%s470_s3 + $0x18] sm:$0xff] }
   0x6   :  { %316 = vmatprep.subr.bf16.mxu0 %v315_v6  ;;  %v319_v10 = vpack.c.bf16 %v143_v9, %v142_v8  ;;  %v323_v13 = vpack.c.bf16 %v145_v12, %v144_v11  ;;  %v146_v14 = vld [vmem:[%s470_s3 + $0x20] sm:$0xff]  ;;  %v147_v15 = vld [vmem:[%s470_s3 + $0x28] sm:$0xff]  ;;  %v148_v17 = vld [vmem:[%s470_s3 + $0x30] sm:$0xff] }
   0x7   :  { %v327_v16 = vpack.c.bf16 %v147_v15, %v146_v14  ;;  %v149_v18 = vld [vmem:[%s470_s3 + $0x38] sm:$0xff]  ;;  %v259_v20 = vld [vmem:[%s471_s4] ss:$0 sm:$0xff] }
   0x8   :  { %320 = vmatprep.subr.bf16.mxu1 %v319_v10  ;;  %v331_v19 = vpack.c.bf16 %v149_v18, %v148_v17  ;;  %34 = vst.msk [vmem:[#allocation2 + $0x8] sm:$0xff] %vm32_vm0, %v259_v20  ;;  %33 = vst.msk [vmem:[#allocation2] sm:$0xff] %vm32_vm0, %v259_v20  ;;  %v260_v21 = vld [vmem:[%s469_s2] ss:$0 sm:$0xff]  ;;  %s366_s2 = smov [#allocation3]  }
   0x9   :  { %318 = vmatpush3.bf16.msra.mxu0 %v315_v6  ;;  %322 = vmatpush3.bf16.msra.mxu1 %v319_v10  ;;  %s248_s3 = sshll.u32 %s366_s2, 4  ;;  %s249_s3 = int_to_ptr.vmem [resolvable:$true] %s248_s3 }
   0xa   :  { %324 = vmatprep.subr.bf16.mxu1 %v323_v13  ;;  %s342_s4 = scalar_lea.vmem %s249_s3, 256  ;;  %p347_p1 = scmp.lt.s32.totalorder %s249_s3, %s249_s3 }
   0xb   :  { %p343_p0 = scmp.ne.s32.totalorder %s249_s3, %s342_s4  ;;  %p348_p2 = scmp.lt.s32.totalorder %s342_s4, %s342_s4 }
   0xc   :  { %290 = vmatmul.mubr.msk.f32.vlgmr.msra.gmra.mrb[0].mxu0 %vm32_vm0, %v36_v7 }
   0xd   :  { %326 = vmatpush3.bf16.msra.mxu1 %v323_v13  ;;  %p349_p3 = por %p348_p2, %p347_p1 }
   0xe   :  { %328 = vmatprep.subr.bf16.mxu1 %v327_v16 }
   0xf   :  { %v141_v36 = vld [vmem:[#allocation2 + $0x8] sm:$0xff]  ;;  %v140_v37 = vld [vmem:[#allocation2] sm:$0xff]  ;;  %p350_p4 = pnand %p349_p3, %p343_p0 }
  0x11   :  { %330 = vmatpush3.bf16.msra.mxu1 %v327_v16 }
  0x12   :  { %332 = vmatprep.subr.bf16.mxu1 %v331_v19 }
  0x15   :  { %334 = vmatpush3.bf16.msra.mxu1 %v331_v19 }
  0xdf   :  { %v291_v22 = vpop.f32.mrb[0].mxu0 }
  0xe0   :  { %v127_v23 = vadd.f32 %v291_v22, %v260_v21  ;;  %v121_v24 = vpop.f32.mrb[1].mxu0 }
  0xe1   :  { %v122_v25 = vadd.f32 %v260_v21, %v121_v24 }
  0xe2   :  { %v133_v26 = vmul.f32 0.70710677, %v127_v23  ;;  %v131_v33 = vmul.f32 0.5, %v127_v23 }
  0xe3   :  { %v132_v27 = vmul.f32 0.70710677, %v122_v25  ;;  %v130_v31 = vmul.f32 0.5, %v122_v25 }
  0xe4   :  { %338 = verf.f32 %v133_v26 }
  0xe5   :  { %340 = verf.f32 %v132_v27 }
  0xee   :  { %v339_v28 = vpop.eup %338 }
  0xef   :  { %v341_v29 = vpop.eup %340  ;;  %v137_v30 = vadd.f32 1.0, %v339_v28 }
  0xf0   :  { %v136_v32 = vadd.f32 1.0, %v341_v29 }
  0xf1   :  { %v139_v35 = vmul.f32 %v137_v30, %v131_v33 }
  0xf2   :  { %v138_v34 = vmul.f32 %v136_v32, %v130_v31 }
  0xf4   :  { %308 = vmatprep.mubr.msk.f32.mxu1 %vm150_vm1, %v138_v34 }
  0xf5   :  { %309 = vmatmul.mubr.msk.f32.vlgmr.msra.gmra.mrb[0].mxu1 %vm150_vm1, %v139_v35 }
 0x1c8   :  { %v310_v38 = vpop.f32.mrb[0].mxu1 }
 0x1c9   :  { %v233_v39 = vadd.f32 %v310_v38, %v141_v36  ;;  %v223_v40 = vpop.f32.mrb[1].mxu1 }
 0x1ca   :  { %v232_v41 = vadd.f32 %v223_v40, %v140_v37 }
 0x1cb   :  { %235 = vst.msk [vmem:[#allocation2 + $0x8] sm:$0xff] %vm32_vm0, %v233_v39 }
 0x1cc   :  { %234 = vst.msk [vmem:[#allocation2] sm:$0xff] %vm32_vm0, %v232_v41 }
 0x1d2   :  { %v240_v42 = vld [vmem:[#allocation2 + $0x8] sm:$0xff] }
 0x1d3   :  { %v239_v43 = vld [vmem:[#allocation2] sm:$0xff]  ;;  %242 = vst.msk [vmem:[#allocation3 + $0x8] sm:$0xff] %vm32_vm0, %v240_v42 }
 0x1d4   :  { %241 = vst.msk [vmem:[#allocation3] sm:$0xff] %vm32_vm0, %v239_v43 }
 0x1d5   :  { %353 = shalt.err (!%p350_p4)
}
 0x1d6   :  { %s354_s25 = scalar_lea.hbm %s472_s5, 256 }
 0x1d7   :  { %p355_p5 = scmp.ne.s32.totalorder %s472_s5, %s354_s25  ;;  %p358_p6 = scmp.lt.u32.totalorder %s354_s25, %s472_s5 }
 0x1d9   :  { %p360_p7 = pnand %p358_p6, %p355_p5 }
 0x1db   :  { %363 = shalt.err (!%p360_p7)
}
 0x1dc   :  { %s367_s30 = smov 128   ;;  %s368_s1 = smov 8  }
 0x1dd   :  { %254 = dma.vmem_to_hbm [thread:$0]  %s249_s3, 256, %s472_s5, [#allocation4], %s367_s30, %s367_s30, %s368_s1  }
 0x1de   :  { %364 = dma.done.wait [#allocation4], 256  }
 0x1df   :  { %365 = vsyncadd [#allocation4], 4294967040 }
 0x1e0   :  { %258 = vsyncpa [#allocation4], 1 }

</bundles_post_ra>
